<compile_context>
chip_gen: v7x
topology: tpu7x:2x2x1
jax: 0.10.0
libtpu: 0.0.40
codegen_flags: <defaults>
</compile_context>

<pallas_src>
import jax
import jax.numpy as jnp
from jax.experimental import pallas as pl
from jax.experimental.pallas import tpu as pltpu

# Lane-dense last dim: 4 x 128 lanes -> wide unmasked stores, fat DMA.
_LANE_W = 512
# itemsize -> native sublane tile multiple (f32: 8, bf16: 16, int8/fp8: 32).
_SUBLANE_MULT = {4: 8, 2: 16, 1: 32}


def _round_up(x: int, m: int) -> int:
    return ((x + m - 1) // m) * m


def _vmem_limit_bytes() -> int:
    """Generation-aware scoped-VMEM budget (safe on v5e/v6e/v7x)."""
    try:
        cap = pltpu.get_tpu_info().vmem_capacity_bytes
    except Exception:
        cap = 64 * 1024 * 1024  # conservative: v7x physical VMEM per TC
    # Never exceed half of physical VMEM; never below 16 MiB (v5e default).
    return max(16 * 1024 * 1024, min(32 * 1024 * 1024, cap // 2))


_VMEM_LIMIT = _vmem_limit_bytes()
# 2 x input + 2 x output double buffers must fit with 2x headroom.
_TARGET_BLOCK_BYTES = _VMEM_LIMIT // 8  # 4 MiB at the 32 MiB limit


def _copy_kernel(x_ref, o_ref):
    # Identity copy of one lane-dense (tile_rows, _LANE_W) block.
    o_ref[...] = x_ref[...]


def _pick_tile_rows(rows: int, itemsize: int) -> int:
    """Tile height: large blocks, dtype-aware sublane multiple, >=2 grid steps
    for medium/large inputs (v7x dual-TC sharding), cdiv handles raggedness."""
    sub = _SUBLANE_MULT.get(itemsize, 8)
    if rows < sub:
        return rows  # block == full (tiny) first-dim extent is always legal
    target = max(sub, (_TARGET_BLOCK_BYTES // (_LANE_W * itemsize)) // sub * sub)
    if rows >= 2 * sub:
        # Keep the grid at >=2 steps so "parallel" can use both v7x TCs.
        target = min(target, _round_up(pl.cdiv(rows, 2), sub))
    return min(target, _round_up(rows, sub))


@jax.jit
def _pallas_identity(x: jax.Array) -> jax.Array:
    """Identity copy through a tiled, lane-dense Pallas TPU streaming kernel."""
    if x.size == 0:
        return x
    orig_shape, n = x.shape, x.size

    rows = pl.cdiv(n, _LANE_W)
    padded = rows * _LANE_W
    flat = x.reshape(-1)
    if padded != n:
        # Pad onto the lane-dense tiled path (no single-full-array fallback).
        flat = jnp.pad(flat, (0, padded - n))
    flat2d = flat.reshape(rows, _LANE_W)

    tile_rows = _pick_tile_rows(rows, flat2d.dtype.itemsize)
    grid = (pl.cdiv(rows, tile_rows),)  # ragged last block is masked by Pallas

    out = pl.pallas_call(
        _copy_kernel,
        out_shape=jax.ShapeDtypeStruct((rows, _LANE_W), flat2d.dtype),
        grid=grid,
        in_specs=[pl.BlockSpec((tile_rows, _LANE_W), lambda i: (i, 0))],
        out_specs=pl.BlockSpec((tile_rows, _LANE_W), lambda i: (i, 0)),
        # Aliases an intermediate (padded/reshaped) buffer under jit; the
        # caller's array is NOT donated and remains readable afterwards.
        input_output_aliases={0: 0},
        compiler_params=pltpu.CompilerParams(
            dimension_semantics=("parallel",),
            vmem_limit_bytes=_VMEM_LIMIT,
        ),
    )(flat2d)

    if padded != n:
        out = out.reshape(-1)[:n]
    return out.reshape(orig_shape)


class Decoder:
    """JAX mirror of the PyTorch base Decoder interface."""

    def __init__(self):
        pass

    def init_state(self, enc_outputs):
        raise NotImplementedError

    def forward(self, X, state):
        raise NotImplementedError

    def __call__(self, X, state):
        return self.forward(X, state)


class AttentionDecoder(Decoder):
    """JAX/Pallas mirror of the PyTorch AttentionDecoder stub."""

    def __init__(self):
        super().__init__()
        # Reference __init__ defines no parameters (just `pass`).

    def init_state(self, enc_outputs):
        # Reference: `pass` -> returns None.
        return None

    def forward(self, X, state):
        # Reference: `pass` -> returns None (abstract stub; no compute here).
        return None


if __name__ == "__main__":
    key = jax.random.PRNGKey(0)
    k1, k2, k3 = jax.random.split(key, 3)

    # Small shape consistent with the module's (batch, seq, hidden) usage.
    B, T, H = 2, 8, 32
    X = jax.random.normal(k1, (B, T, H), dtype=jnp.float32)
    y = _pallas_identity(X)
    jax.block_until_ready(y)
    assert y.shape == X.shape and y.dtype == X.dtype
    assert bool(jnp.all(y == X))

    # Multi-grid-step path: n = 524288 -> rows = 1024 -> 2 parallel 512x512 blocks.
    X2 = jax.random.normal(k2, (4, 256, 512), dtype=jnp.float32)
    y2 = _pallas_identity(X2)
    jax.block_until_ready(y2)
    assert y2.shape == X2.shape and bool(jnp.all(y2 == X2))

    # Non-128-divisible element count: exercises the padded lane-dense path.
    X3 = jax.random.normal(k3, (3, 7, 5), dtype=jnp.float32)
    y3 = _pallas_identity(X3)
    jax.block_until_ready(y3)
    assert y3.shape == X3.shape and bool(jnp.all(y3 == X3))

    # Reproduce the exact reference semantics of the stub module.
    dec = AttentionDecoder()
    state = dec.init_state(enc_outputs=None)   # None, per reference
    out = dec(X, state)                        # None, per reference
    assert state is None and out is None

    print("KERNEL_OK")
</pallas_src>

<mosaic_0001>
module attributes {stable_mosaic.version = 11 : i64} {
  func.func @_copy_kernel(%arg0: i32, %arg1: memref<1x512xf32, #tpu.memory_space<vmem>>, %arg2: memref<1x512xf32, #tpu.memory_space<vmem>>) attributes {dimension_semantics = [#tpu.dimension_semantics<parallel>], iteration_bounds = array<i64: 1>, scalar_prefetch = 0 : i64, scratch_operands = 0 : i64, tpu.core_type = #tpu.core_type<tc>, window_params = [{transform_indices = @transform_0, window_bounds = array<i64: 1, 512>}, {transform_indices = @transform_1, window_bounds = array<i64: 1, 512>}]} {
    %c0 = arith.constant 0 : index
    %c0_0 = arith.constant 0 : index
    %0 = vector.load %arg1[%c0, %c0_0] : memref<1x512xf32, #tpu.memory_space<vmem>>, vector<1x512xf32>
    %c0_1 = arith.constant 0 : index
    %c0_2 = arith.constant 0 : index
    %1 = vector.load %arg2[%c0_1, %c0_2] : memref<1x512xf32, #tpu.memory_space<vmem>>, vector<1x512xf32>
    tpu.vector_store %arg2[%c0_1, %c0_2], %0 {strides = array<i32>} : memref<1x512xf32, #tpu.memory_space<vmem>>, vector<1x512xf32>,
    return
  }
  func.func @transform_0(%arg0: i32) -> (i32, i32) {
    %c0_i32 = arith.constant 0 : i32
    %c0_i32_0 = arith.constant 0 : i32
    return %arg0, %c0_i32 : i32, i32
  }
  func.func @transform_1(%arg0: i32) -> (i32, i32) {
    %c0_i32 = arith.constant 0 : i32
    %c0_i32_0 = arith.constant 0 : i32
    return %arg0, %c0_i32 : i32, i32
  }
}

</mosaic_0001>

<bundles_post_ra>
// kernel: _pallas_identity.1
= control target key start
LH: loop header
LB: loop body
LE: loop exit
PB: predicated region body
PF: predicated region fallthrough
CT: control target
= control target key end

     0   :  { %v9_v0 = vlaneseq  ;;  %s34_s0 = inlined_call_operand.vmem [shape: f32[1,512], index: 0, kind: input, shape index: {}, may-alias: {0,1}]   ;;  %s35_s1 = inlined_call_operand.vmem [shape: f32[1,512], index: 1, kind: output, shape index: {}, may-alias: {0,1}]  }
   0x1   :  { %v8_v1 = vld [vmem:[%s34_s0] sm:$0xf] }
   0x2   :  { %vm11_vm0 = vcmp.lt.s32.totalorder %v9_v0, 512 }
   0x3   :  { %13 = vst.msk [vmem:[%s35_s1] sm:$0xf] %vm11_vm0, %v8_v1 }

</bundles_post_ra>
